<compile_context>
chip_gen: v7x
topology: tpu7x:2x2x1
jax: 0.10.0
libtpu: 0.0.40
codegen_flags: <defaults>
</compile_context>

<pallas_src>
import jax
import jax.numpy as jnp
from jax.experimental import pallas as pl
from jax.experimental.pallas import tpu as pltpu

_LANE = 128
_SUB = 32  # worst-case sublane packing: f32=8, bf16=16, int8/fp8=32


def _smooth_l1_elems(pred, target_f32):
    # Branch-free smooth-L1 (beta=1.0): c=min(|d|,1); elem = c*(|d| - 0.5*c)
    #   |d| <  1: c=|d| -> 0.5*d^2
    #   |d| >= 1: c=1   -> |d| - 0.5
    diff = pred.astype(jnp.float32) - target_f32
    ad = jnp.abs(diff)
    c = jnp.minimum(ad, 1.0)
    return c * (ad - 0.5 * c)


def _make_kernel(rows, tile_rows, tiles_per_split, fold, need_mask):
    """Build the kernel with all tiling parameters baked in as constants."""

    def kernel(d1_ref, d2_ref, d3_ref, t_ref, o1_ref, o2_ref, o3_ref):
        p = pl.program_id(0)  # split across TensorCores (v7x) / trivial loop
        i = pl.program_id(1)  # inner reduction ("arbitrary") axis

        @pl.when(i == 0)
        def _():
            o1_ref[...] = jnp.zeros_like(o1_ref)
            o2_ref[...] = jnp.zeros_like(o2_ref)
            o3_ref[...] = jnp.zeros_like(o3_ref)

        t = t_ref[...].astype(jnp.float32)

        if need_mask:
            # Ragged last tile: rows beyond `rows` hold unspecified data from
            # the boundary block read -> zero their contribution (row-level
            # mask only; the sub-128 element tail is covered by zero padding).
            row_start = (p * tiles_per_split + i) * tile_rows
            valid = rows - row_start
            ridx = jax.lax.broadcasted_iota(jnp.int32, (tile_rows, 1), 0)
            row_mask = ridx < valid
        else:
            row_mask = None

        def accum(d_ref, o_ref):
            e = _smooth_l1_elems(d_ref[...], t)
            if row_mask is not None:
                e = jnp.where(row_mask, e, 0.0)
            if fold:
                # Fold (tile_rows, 128) -> (8, 128): tile-aligned reshape plus
                # leading-axis sum = plain VALU vreg adds (no XLU, tiny vst).
                e = e.reshape(tile_rows // 8, 8, _LANE).sum(axis=0)
            o_ref[...] += e

        accum(d1_ref, o1_ref)
        accum(d2_ref, o2_ref)
        accum(d3_ref, o3_ref)

    return kernel


def _chip_has_two_tensorcores():
    # v7x exposes 2 TensorCores per chip; v5e/v6e have 1.  Conservative string
    # match -> on unknown hardware we simply skip the core split (no harm).
    try:
        kind = str(getattr(jax.devices()[0], "device_kind", "")).lower()
    except Exception:
        return False
    return "v7" in kind


def smooth_l1_loss_pallas(disp1, disp2, disp3, target, *, tile_rows=1024, nsplit=None):
    assert disp1.shape == disp2.shape == disp3.shape == target.shape
    n = disp1.size
    assert n > 0

    # ---- Flatten to lane-dense (rows, 128) slabs in the SOURCE dtype.
    # ravel + reshape are metadata-only for contiguous inputs; a zero-pad copy
    # happens only when n % 128 != 0 (pad value 0 -> zero loss contribution).
    rem = n % _LANE

    def to_slab(x):
        flat = jnp.ravel(x)
        if rem:
            flat = jnp.pad(flat, (0, _LANE - rem))
        return flat.reshape(-1, _LANE)

    d1, d2, d3, t = map(to_slab, (disp1, disp2, disp3, target))
    rows = d1.shape[0]

    # ---- Tiling: round the row tile to the worst-case sublane packing; small
    # inputs use a single full-extent tile (any row count is legal there).
    tile_rows = max(_SUB, -(-tile_rows // _SUB) * _SUB)
    if rows <= tile_rows:
        tile_rows = rows
        tiles_total = 1
    else:
        tiles_total = -(-rows // tile_rows)

    # ---- Core split: only worthwhile on multi-TensorCore chips (v7x).
    is_multi_tc = _chip_has_two_tensorcores()
    if nsplit is None:
        nsplit = 2 if is_multi_tc else 1
    if nsplit != 2 or tiles_total < 2 or tiles_total % 2:
        nsplit = 1  # keep the grid rectangular with no empty tiles
    tiles_per_split = tiles_total // nsplit

    fold = tile_rows % 8 == 0          # (8,128) folded accumulator possible?
    need_mask = rows % tile_rows != 0  # ragged last tile -> in-kernel masking
    out_rows = 8 if fold else tile_rows

    kernel = _make_kernel(rows, tile_rows, tiles_per_split, fold, need_mask)

    in_spec = pl.BlockSpec(
        (tile_rows, _LANE), lambda p, i: (p * tiles_per_split + i, 0)
    )
    out_spec = pl.BlockSpec((out_rows, _LANE), lambda p, i: (p, 0))
    out_sds = jax.ShapeDtypeStruct((nsplit * out_rows, _LANE), jnp.float32)

    if nsplit == 2 and is_multi_tc:
        sem0 = pltpu.CORE_PARALLEL  # shard the row range across both TCs
    elif nsplit == 2:
        sem0 = pltpu.PARALLEL       # forced split on a 1-TC chip: serial loop
    else:
        sem0 = pltpu.ARBITRARY

    o1, o2, o3 = pl.pallas_call(
        kernel,
        out_shape=(out_sds, out_sds, out_sds),
        grid_spec=pltpu.PrefetchScalarGridSpec(
            num_scalar_prefetch=0,
            grid=(nsplit, tiles_per_split),
            in_specs=[in_spec, in_spec, in_spec, in_spec],
            out_specs=[out_spec, out_spec, out_spec],
        ),
        compiler_params=pltpu.CompilerParams(
            dimension_semantics=(sem0, pltpu.ARBITRARY),
        ),
    )(d1, d2, d3, t)

    # Final tiny cross-lane reduce + mean over the TRUE element count.
    inv_n = 1.0 / n
    return jnp.sum(o1) * inv_n, jnp.sum(o2) * inv_n, jnp.sum(o3) * inv_n


def smooth_l1_ref(pred, target):
    diff = pred.astype(jnp.float32) - target.astype(jnp.float32)
    ad = jnp.abs(diff)
    return jnp.mean(jnp.where(ad < 1.0, 0.5 * diff * diff, ad - 0.5))


def _check(shape, key, dtype=jnp.float32, **kwargs):
    k1, k2, k3, k4 = jax.random.split(key, 4)
    mk = lambda k: (jax.random.normal(k, shape, dtype=jnp.float32) * 2.0).astype(dtype)
    disp1, disp2, disp3, target = mk(k1), mk(k2), mk(k3), mk(k4)

    l1, l2, l3 = smooth_l1_loss_pallas(disp1, disp2, disp3, target, **kwargs)
    jax.block_until_ready((l1, l2, l3))

    for l, d in ((l1, disp1), (l2, disp2), (l3, disp3)):
        r = smooth_l1_ref(d, target)
        assert jnp.allclose(l, r, rtol=1e-5, atol=1e-6), (shape, kwargs, l, r)


if __name__ == "__main__":
    key = jax.random.PRNGKey(0)
    ks = jax.random.split(key, 5)

    # Small disparity-map-like (B, H, W): single full-extent tile, no pad/mask.
    _check((2, 16, 16), ks[0])

    # Multi-tile with a ragged last tile: exercises in-kernel tail masking and
    # the folded (8,128) accumulator (70 rows, tile 32 -> 3 tiles, last has 6).
    _check((2, 64, 70), ks[1], tile_rows=16)

    # Even tile count with a forced 2-way split: exercises the core-split index
    # arithmetic (plain serial "parallel" loop on 1-TC chips).
    _check((2, 64, 64), ks[2], tile_rows=32, nsplit=2)

    # n not a multiple of 128: zero-pad fallback path (pad contributes 0).
    _check((2, 16, 17), ks[3])

    # bf16 inputs stay bf16 in HBM, cast to f32 inside the kernel.
    _check((2, 64, 64), ks[4], dtype=jnp.bfloat16, tile_rows=32)

    print("KERNEL_OK")
</pallas_src>

<mosaic_0001>
module attributes {stable_mosaic.version = 11 : i64} {
  func.func @kernel(%arg0: i32, %arg1: i32, %arg2: memref<4x128xf32, #tpu.memory_space<vmem>>, %arg3: memref<4x128xf32, #tpu.memory_space<vmem>>, %arg4: memref<4x128xf32, #tpu.memory_space<vmem>>, %arg5: memref<4x128xf32, #tpu.memory_space<vmem>>, %arg6: memref<4x128xf32, #tpu.memory_space<vmem>>, %arg7: memref<4x128xf32, #tpu.memory_space<vmem>>, %arg8: memref<4x128xf32, #tpu.memory_space<vmem>>) attributes {dimension_semantics = [#tpu.dimension_semantics<arbitrary>, #tpu.dimension_semantics<arbitrary>], iteration_bounds = array<i64: 1, 1>, scalar_prefetch = 0 : i64, scratch_operands = 0 : i64, tpu.core_type = #tpu.core_type<tc>, window_params = [{transform_indices = @transform_0, window_bounds = array<i64: 4, 128>}, {transform_indices = @transform_1, window_bounds = array<i64: 4, 128>}, {transform_indices = @transform_2, window_bounds = array<i64: 4, 128>}, {transform_indices = @transform_3, window_bounds = array<i64: 4, 128>}, {transform_indices = @transform_4, window_bounds = array<i64: 4, 128>}, {transform_indices = @transform_5, window_bounds = array<i64: 4, 128>}, {transform_indices = @transform_6, window_bounds = array<i64: 4, 128>}]} {
    %c0_i32 = arith.constant 0 : i32
    %0 = arith.cmpi eq, %arg1, %c0_i32 : i32
    %1 = arith.extui %0 : i1 to i32
    %c0_i32_0 = arith.constant 0 : i32
    %2 = arith.cmpi ne, %1, %c0_i32_0 : i32
    scf.if %2 {
      %cst_25 = arith.constant 0.000000e+00 : f32
      %40 = vector.broadcast %cst_25 : f32 to vector<4x128xf32>
      %c0_26 = arith.constant 0 : index
      %c0_27 = arith.constant 0 : index
      %41 = vector.load %arg6[%c0_26, %c0_27] : memref<4x128xf32, #tpu.memory_space<vmem>>, vector<4x128xf32>
      tpu.vector_store %arg6[%c0_26, %c0_27], %40 {strides = array<i32>} : memref<4x128xf32, #tpu.memory_space<vmem>>, vector<4x128xf32>,
      %cst_28 = arith.constant 0.000000e+00 : f32
      %42 = vector.broadcast %cst_28 : f32 to vector<4x128xf32>
      %c0_29 = arith.constant 0 : index
      %c0_30 = arith.constant 0 : index
      %43 = vector.load %arg7[%c0_29, %c0_30] : memref<4x128xf32, #tpu.memory_space<vmem>>, vector<4x128xf32>
      tpu.vector_store %arg7[%c0_29, %c0_30], %42 {strides = array<i32>} : memref<4x128xf32, #tpu.memory_space<vmem>>, vector<4x128xf32>,
      %cst_31 = arith.constant 0.000000e+00 : f32
      %44 = vector.broadcast %cst_31 : f32 to vector<4x128xf32>
      %c0_32 = arith.constant 0 : index
      %c0_33 = arith.constant 0 : index
      %45 = vector.load %arg8[%c0_32, %c0_33] : memref<4x128xf32, #tpu.memory_space<vmem>>, vector<4x128xf32>
      tpu.vector_store %arg8[%c0_32, %c0_33], %44 {strides = array<i32>} : memref<4x128xf32, #tpu.memory_space<vmem>>, vector<4x128xf32>,
    } else {
    }
    %c0 = arith.constant 0 : index
    %c0_1 = arith.constant 0 : index
    %3 = vector.load %arg5[%c0, %c0_1] : memref<4x128xf32, #tpu.memory_space<vmem>>, vector<4x128xf32>
    %c0_2 = arith.constant 0 : index
    %c0_3 = arith.constant 0 : index
    %4 = vector.load %arg2[%c0_2, %c0_3] : memref<4x128xf32, #tpu.memory_space<vmem>>, vector<4x128xf32>
    %5 = arith.subf %4, %3 : vector<4x128xf32>
    %6 = math.absf %5 : vector<4x128xf32>
    %cst = arith.constant 1.000000e+00 : f32
    %7 = vector.broadcast %cst : f32 to vector<4x128xf32>
    %8 = arith.minimumf %6, %7 : vector<4x128xf32>
    %cst_4 = arith.constant 5.000000e-01 : f32
    %9 = vector.broadcast %cst_4 : f32 to vector<4x128xf32>
    %10 = arith.mulf %9, %8 : vector<4x128xf32>
    %11 = arith.subf %6, %10 : vector<4x128xf32>
    %12 = arith.mulf %8, %11 : vector<4x128xf32>
    %c0_5 = arith.constant 0 : index
    %c0_6 = arith.constant 0 : index
    %13 = vector.load %arg6[%c0_5, %c0_6] : memref<4x128xf32, #tpu.memory_space<vmem>>, vector<4x128xf32>
    %14 = arith.addf %13, %12 : vector<4x128xf32>
    %c0_7 = arith.constant 0 : index
    %c0_8 = arith.constant 0 : index
    %15 = vector.load %arg6[%c0_7, %c0_8] : memref<4x128xf32, #tpu.memory_space<vmem>>, vector<4x128xf32>
    tpu.vector_store %arg6[%c0_7, %c0_8], %14 {strides = array<i32>} : memref<4x128xf32, #tpu.memory_space<vmem>>, vector<4x128xf32>,
    %c0_9 = arith.constant 0 : index
    %c0_10 = arith.constant 0 : index
    %16 = vector.load %arg3[%c0_9, %c0_10] : memref<4x128xf32, #tpu.memory_space<vmem>>, vector<4x128xf32>
    %17 = arith.subf %16, %3 : vector<4x128xf32>
    %18 = math.absf %17 : vector<4x128xf32>
    %cst_11 = arith.constant 1.000000e+00 : f32
    %19 = vector.broadcast %cst_11 : f32 to vector<4x128xf32>
    %20 = arith.minimumf %18, %19 : vector<4x128xf32>
    %cst_12 = arith.constant 5.000000e-01 : f32
    %21 = vector.broadcast %cst_12 : f32 to vector<4x128xf32>
    %22 = arith.mulf %21, %20 : vector<4x128xf32>
    %23 = arith.subf %18, %22 : vector<4x128xf32>
    %24 = arith.mulf %20, %23 : vector<4x128xf32>
    %c0_13 = arith.constant 0 : index
    %c0_14 = arith.constant 0 : index
    %25 = vector.load %arg7[%c0_13, %c0_14] : memref<4x128xf32, #tpu.memory_space<vmem>>, vector<4x128xf32>
    %26 = arith.addf %25, %24 : vector<4x128xf32>
    %c0_15 = arith.constant 0 : index
    %c0_16 = arith.constant 0 : index
    %27 = vector.load %arg7[%c0_15, %c0_16] : memref<4x128xf32, #tpu.memory_space<vmem>>, vector<4x128xf32>
    tpu.vector_store %arg7[%c0_15, %c0_16], %26 {strides = array<i32>} : memref<4x128xf32, #tpu.memory_space<vmem>>, vector<4x128xf32>,
    %c0_17 = arith.constant 0 : index
    %c0_18 = arith.constant 0 : index
    %28 = vector.load %arg4[%c0_17, %c0_18] : memref<4x128xf32, #tpu.memory_space<vmem>>, vector<4x128xf32>
    %29 = arith.subf %28, %3 : vector<4x128xf32>
    %30 = math.absf %29 : vector<4x128xf32>
    %cst_19 = arith.constant 1.000000e+00 : f32
    %31 = vector.broadcast %cst_19 : f32 to vector<4x128xf32>
    %32 = arith.minimumf %30, %31 : vector<4x128xf32>
    %cst_20 = arith.constant 5.000000e-01 : f32
    %33 = vector.broadcast %cst_20 : f32 to vector<4x128xf32>
    %34 = arith.mulf %33, %32 : vector<4x128xf32>
    %35 = arith.subf %30, %34 : vector<4x128xf32>
    %36 = arith.mulf %32, %35 : vector<4x128xf32>
    %c0_21 = arith.constant 0 : index
    %c0_22 = arith.constant 0 : index
    %37 = vector.load %arg8[%c0_21, %c0_22] : memref<4x128xf32, #tpu.memory_space<vmem>>, vector<4x128xf32>
    %38 = arith.addf %37, %36 : vector<4x128xf32>
    %c0_23 = arith.constant 0 : index
    %c0_24 = arith.constant 0 : index
    %39 = vector.load %arg8[%c0_23, %c0_24] : memref<4x128xf32, #tpu.memory_space<vmem>>, vector<4x128xf32>
    tpu.vector_store %arg8[%c0_23, %c0_24], %38 {strides = array<i32>} : memref<4x128xf32, #tpu.memory_space<vmem>>, vector<4x128xf32>,
    return
  }
  func.func @transform_0(%arg0: i32, %arg1: i32) -> (i32, i32) {
    %c1_i32 = arith.constant 1 : i32
    %0 = arith.muli %arg0, %c1_i32 : i32
    %1 = arith.addi %0, %arg1 : i32
    %c0_i32 = arith.constant 0 : i32
    %c0_i32_0 = arith.constant 0 : i32
    return %1, %c0_i32 : i32, i32
  }
  func.func @transform_1(%arg0: i32, %arg1: i32) -> (i32, i32) {
    %c1_i32 = arith.constant 1 : i32
    %0 = arith.muli %arg0, %c1_i32 : i32
    %1 = arith.addi %0, %arg1 : i32
    %c0_i32 = arith.constant 0 : i32
    %c0_i32_0 = arith.constant 0 : i32
    return %1, %c0_i32 : i32, i32
  }
  func.func @transform_2(%arg0: i32, %arg1: i32) -> (i32, i32) {
    %c1_i32 = arith.constant 1 : i32
    %0 = arith.muli %arg0, %c1_i32 : i32
    %1 = arith.addi %0, %arg1 : i32
    %c0_i32 = arith.constant 0 : i32
    %c0_i32_0 = arith.constant 0 : i32
    return %1, %c0_i32 : i32, i32
  }
  func.func @transform_3(%arg0: i32, %arg1: i32) -> (i32, i32) {
    %c1_i32 = arith.constant 1 : i32
    %0 = arith.muli %arg0, %c1_i32 : i32
    %1 = arith.addi %0, %arg1 : i32
    %c0_i32 = arith.constant 0 : i32
    %c0_i32_0 = arith.constant 0 : i32
    return %1, %c0_i32 : i32, i32
  }
  func.func @transform_4(%arg0: i32, %arg1: i32) -> (i32, i32) {
    %c0_i32 = arith.constant 0 : i32
    %c0_i32_0 = arith.constant 0 : i32
    return %arg0, %c0_i32 : i32, i32
  }
  func.func @transform_5(%arg0: i32, %arg1: i32) -> (i32, i32) {
    %c0_i32 = arith.constant 0 : i32
    %c0_i32_0 = arith.constant 0 : i32
    return %arg0, %c0_i32 : i32, i32
  }
  func.func @transform_6(%arg0: i32, %arg1: i32) -> (i32, i32) {
    %c0_i32 = arith.constant 0 : i32
    %c0_i32_0 = arith.constant 0 : i32
    return %arg0, %c0_i32 : i32, i32
  }
}

</mosaic_0001>

<bundles_post_ra>
// kernel: tpu_custom_call.1
= control target key start
LH: loop header
LB: loop body
LE: loop exit
PB: predicated region body
PF: predicated region fallthrough
CT: control target
= control target key end

     0   :  { %12 = vsyncpa [#allocation3], 0  ;;  %s426_s0 = inlined_call_operand.hbm [shape: f32[4,128], index: 0, kind: input, shape index: {}]   ;;  %s427_s1 = inlined_call_operand.hbm [shape: f32[4,128], index: 1, kind: input, shape index: {}]   ;;  %s428_s2 = inlined_call_operand.vmem [shape: f32[4,128], index: 2, kind: input, shape index: {}]   ;;  %s429_s3 = inlined_call_operand.vmem [shape: f32[4,128], index: 3, kind: input, shape index: {}]   ;;  %s430_s4 = inlined_call_operand.hbm [shape: f32[4,128], index: 4, kind: output, shape index: {0}]   ;;  %s431_s5 = inlined_call_operand.hbm [shape: f32[4,128], index: 5, kind: output, shape index: {1}]   ;;  %s432_s6 = inlined_call_operand.hbm [shape: f32[4,128], index: 6, kind: output, shape index: {2}]  }
   0x1   :  { %13 = vsyncpa [#allocation6], 0 }
   0x2   :  { %14 = vsyncpa [#allocation4], 0 }
   0x3   :  { %15 = vsyncpa [#allocation9], 0  ;;  %s305_s21 = smov [#allocation2]   ;;  %s306_s23 = smov [#allocation5]  }
   0x4   :  { %s25_s22 = sshll.u32 %s305_s21, 4  ;;  %s38_s24 = sshll.u32 %s306_s23, 4  ;;  %s26_s22 = int_to_ptr.vmem [resolvable:$true] %s25_s22  ;;  %s39_s24 = int_to_ptr.vmem [resolvable:$true] %s38_s24 }
   0x5   :  { %s187_s27 = scalar_lea.hbm %s426_s0, 64 }
   0x6   :  { %p188_p0 = scmp.ne.s32.totalorder %s426_s0, %s187_s27  ;;  %p191_p1 = scmp.lt.u32.totalorder %s187_s27, %s426_s0 }
   0x8   :  { %p193_p2 = pnand %p191_p1, %p188_p0 }
   0xa   :  { %196 = shalt.err (!%p193_p2)
}
   0xb   :  { %s197_s8 = scalar_lea.vmem %s26_s22, 64  ;;  %p202_p4 = scmp.lt.s32.totalorder %s26_s22, %s26_s22 }
   0xc   :  { %p198_p3 = scmp.ne.s32.totalorder %s26_s22, %s197_s8  ;;  %p203_p5 = scmp.lt.s32.totalorder %s197_s8, %s197_s8 }
   0xe   :  { %p204_p6 = por %p203_p5, %p202_p4 }
  0x10   :  { %p205_p7 = pnand %p204_p6, %p198_p3 }
  0x12   :  { %208 = shalt.err (!%p205_p7)
}
  0x13   :  { %28 = dma.hbm_to_vmem [thread:$0]  %s426_s0, 64, %s26_s22, [#allocation3]  }
  0x14   :  { %s209_s13 = scalar_lea.hbm %s427_s1, 64 }
  0x15   :  { %p210_p8 = scmp.ne.s32.totalorder %s427_s1, %s209_s13  ;;  %p213_p9 = scmp.lt.u32.totalorder %s209_s13, %s427_s1 }
  0x17   :  { %p215_p10 = pnand %p213_p9, %p210_p8 }
  0x19   :  { %218 = shalt.err (!%p215_p10)
}
  0x1a   :  { %s219_s18 = scalar_lea.vmem %s39_s24, 64  ;;  %p224_p12 = scmp.lt.s32.totalorder %s39_s24, %s39_s24 }
  0x1b   :  { %p220_p11 = scmp.ne.s32.totalorder %s39_s24, %s219_s18  ;;  %p225_p13 = scmp.lt.s32.totalorder %s219_s18, %s219_s18 }
  0x1d   :  { %p226_p0 = por %p225_p13, %p224_p12 }
  0x1f   :  { %p227_p1 = pnand %p226_p0, %p220_p11 }
  0x21   :  { %230 = shalt.err (!%p227_p1)
}
  0x22   :  { %41 = dma.hbm_to_vmem [thread:$0]  %s427_s1, 64, %s39_s24, [#allocation6]  }
  0x23   :  { %297 = dma.done.wait [#allocation3], 64  }
  0x24   :  { %298 = vsyncadd [#allocation3], 4294967232 }
  0x25   :  { %299 = dma.done.wait [#allocation6], 64  }
  0x26   :  { %300 = vsyncadd [#allocation6], 4294967232  ;;  %v307_v0 = vmov 0.0   ;;  %v95_v1 = vld [vmem:[%s429_s3] sm:$0xf]  ;;  %s308_s1 = smov [#allocation8]  }
  0x27   :  { %93 = vst [vmem:[#allocation8] sm:$0xf] %v307_v0  ;;  %92 = vst [vmem:[#allocation7] sm:$0xf] %v307_v0  ;;  %v106_v2 = vld [vmem:[#allocation5] sm:$0xf] }
  0x28   :  { %94 = vst [vmem:[#allocation10] sm:$0xf] %v307_v0  ;;  %v96_v3 = vld [vmem:[#allocation2] sm:$0xf]  ;;  %v107_v4 = vsub.f32 %v106_v2, %v95_v1  ;;  %s142_s3 = sshll.u32 %s308_s1, 4  ;;  %s310_s25 = smov [#allocation10]   ;;  %s143_s3 = int_to_ptr.vmem [resolvable:$true] %s142_s3 }
  0x29   :  { %v97_v5 = vsub.f32 %v96_v3, %v95_v1  ;;  %v116_v6 = vld [vmem:[%s428_s2] sm:$0xf]  ;;  %s309_s2 = smov [#allocation7]   ;;  %s152_s26 = sshll.u32 %s310_s25, 4  ;;  %s378_s26 = int_to_ptr.vmem [resolvable:$true] %s152_s26 }
  0x2a   :  { %v117_v7 = vsub.f32 %v116_v6, %v95_v1  ;;  %v108_v8 = vand.u32 2147483647, %v107_v4  ;;  %s132_s24 = sshll.u32 %s309_s2, 4  ;;  %s231_s27 = scalar_lea.vmem %s143_s3, 64  ;;  %s376_s24 = int_to_ptr.vmem [resolvable:$true] %s132_s24 }
  0x2b   :  { %v98_v9 = vand.u32 2147483647, %v97_v5  ;;  %p232_p2 = scmp.ne.s32.totalorder %s143_s3, %s231_s27  ;;  %p236_p3 = scmp.lt.s32.totalorder %s143_s3, %s143_s3 }
  0x2c   :  { %v118_v10 = vand.u32 2147483647, %v117_v7  ;;  %v109_v11 = vmin.f32 %v108_v8, 1.0  ;;  %p237_p4 = scmp.lt.s32.totalorder %s231_s27, %s231_s27 }
  0x2d   :  { %v99_v12 = vmin.f32 %v98_v9, 1.0 }
  0x2e   :  { %v119_v13 = vmin.f32 %v118_v10, 1.0  ;;  %v110_v14 = vmul.f32 0.5, %v109_v11  ;;  %v113_v19 = vld [vmem:[#allocation8] sm:$0xf]  ;;  %v103_v20 = vld [vmem:[#allocation7] sm:$0xf]  ;;  %p238_p5 = por %p237_p4, %p236_p3 }
  0x2f   :  { %v100_v15 = vmul.f32 0.5, %v99_v12  ;;  %v123_v24 = vld [vmem:[#allocation10] sm:$0xf] }
  0x30   :  { %v120_v16 = vmul.f32 0.5, %v119_v13  ;;  %v111_v17 = vsub.f32 %v108_v8, %v110_v14  ;;  %p239_p6 = pnand %p238_p5, %p232_p2 }
  0x31   :  { %v101_v18 = vsub.f32 %v98_v9, %v100_v15 }
  0x32   :  { %v121_v21 = vsub.f32 %v118_v10, %v120_v16  ;;  %v112_v22 = vmul.f32 %v111_v17, %v109_v11 }
  0x33   :  { %v102_v23 = vmul.f32 %v101_v18, %v99_v12 }
  0x34   :  { %v122_v25 = vmul.f32 %v121_v21, %v119_v13  ;;  %v114_v26 = vadd.f32 %v113_v19, %v112_v22 }
  0x35   :  { %v104_v27 = vadd.f32 %v103_v20, %v102_v23 }
  0x36   :  { %v124_v28 = vadd.f32 %v123_v24, %v122_v25  ;;  %115 = vst [vmem:[#allocation8] sm:$0xf] %v114_v26 }
  0x37   :  { %105 = vst [vmem:[#allocation7] sm:$0xf] %v104_v27 }
  0x38   :  { %125 = vst [vmem:[#allocation10] sm:$0xf] %v124_v28 }
  0x39   :  { %242 = shalt.err (!%p239_p6)
}
  0x3a   :  { %s243_s30 = scalar_lea.hbm %s431_s5, 64 }
  0x3b   :  { %p244_p7 = scmp.ne.s32.totalorder %s431_s5, %s243_s30  ;;  %p247_p8 = scmp.lt.u32.totalorder %s243_s30, %s431_s5 }
  0x3d   :  { %p249_p9 = pnand %p247_p8, %p244_p7 }
  0x3f   :  { %252 = shalt.err (!%p249_p9)
}
  0x40   :  { %145 = dma.vmem_to_hbm [thread:$0]  %s143_s3, 64, %s431_s5, [#allocation9]  }
  0x41   :  { %s253_s13 = scalar_lea.vmem %s376_s24, 64  ;;  %p258_p11 = scmp.lt.s32.totalorder %s376_s24, %s376_s24 }
  0x42   :  { %p254_p10 = scmp.ne.s32.totalorder %s376_s24, %s253_s13  ;;  %p259_p12 = scmp.lt.s32.totalorder %s253_s13, %s253_s13 }
  0x44   :  { %p260_p13 = por %p259_p12, %p258_p11 }
  0x46   :  { %p261_p0 = pnand %p260_p13, %p254_p10 }
  0x48   :  { %264 = shalt.err (!%p261_p0)
}
  0x49   :  { %s265_s16 = scalar_lea.hbm %s430_s4, 64 }
  0x4a   :  { %p266_p1 = scmp.ne.s32.totalorder %s430_s4, %s265_s16  ;;  %p269_p2 = scmp.lt.u32.totalorder %s265_s16, %s430_s4 }
  0x4c   :  { %p271_p3 = pnand %p269_p2, %p266_p1 }
  0x4e   :  { %274 = shalt.err (!%p271_p3)
}
  0x4f   :  { %135 = dma.vmem_to_hbm [thread:$0]  %s376_s24, 64, %s430_s4, [#allocation4]  }
  0x50   :  { %s275_s21 = scalar_lea.vmem %s378_s26, 64  ;;  %p280_p5 = scmp.lt.s32.totalorder %s378_s26, %s378_s26 }
  0x51   :  { %p276_p4 = scmp.ne.s32.totalorder %s378_s26, %s275_s21  ;;  %p281_p6 = scmp.lt.s32.totalorder %s275_s21, %s275_s21 }
  0x53   :  { %p282_p7 = por %p281_p6, %p280_p5 }
  0x55   :  { %p283_p8 = pnand %p282_p7, %p276_p4 }
  0x57   :  { %286 = shalt.err (!%p283_p8)
}
  0x58   :  { %s287_s1 = scalar_lea.hbm %s432_s6, 64 }
  0x59   :  { %p288_p9 = scmp.ne.s32.totalorder %s432_s6, %s287_s1  ;;  %p291_p10 = scmp.lt.u32.totalorder %s287_s1, %s432_s6 }
  0x5b   :  { %p293_p11 = pnand %p291_p10, %p288_p9 }
  0x5d   :  { %296 = shalt.err (!%p293_p11)
}
  0x5e   :  { %155 = dma.vmem_to_hbm [thread:$0]  %s378_s26, 64, %s432_s6, [#allocation9]  }
  0x5f   :  { %301 = dma.done.wait [#allocation4], 64  }
  0x60   :  { %302 = vsyncadd [#allocation4], 4294967232 }
  0x61   :  { %303 = dma.done.wait [#allocation9], 128  }
  0x62   :  { %304 = vsyncadd [#allocation9], 4294967168 }
  0x63   :  { %165 = vsyncpa [#allocation3], 1 }
  0x64   :  { %166 = vsyncpa [#allocation6], 1 }
  0x65   :  { %167 = vsyncpa [#allocation4], 1 }
  0x66   :  { %168 = vsyncpa [#allocation9], 1 }

</bundles_post_ra>
